<compile_context>
chip_gen: v5e
topology: v5e:2x2
jax: 0.10.0
libtpu: 0.0.40
codegen_flags: <defaults>
</compile_context>

<pallas_src>
import functools

import jax
import jax.numpy as jnp
from jax.experimental import pallas as pl
from jax.experimental.pallas import tpu as pltpu


def _round_up(x, m):
    return ((x + m - 1) // m) * m


def _eps_greedy_kernel(q_ref, u_ref, rand_ref, out_ref, *, epsilon):
    # q_ref:    VMEM (A, TB) float32   -- batch on lanes, actions on sublanes
    # u_ref:    VMEM (1, TB) float32   -- uniform [0,1) exploration draw per row
    # rand_ref: VMEM (1, TB) int32     -- uniform random action in [0, n_actions)
    # out_ref:  VMEM (1, TB) int32     -- lane-dense output
    q = q_ref[...]
    a, tb = q.shape

    # argmax over the action axis (axis 0), first-maximal-index tie-break.
    ids = jax.lax.broadcasted_iota(jnp.int32, (a, tb), 0)
    max_val = jnp.max(q, axis=0, keepdims=True)                 # (1, TB)
    cand = jnp.where(q == max_val, ids, jnp.int32(a))           # non-max -> sentinel a
    greedy = jnp.min(cand, axis=0, keepdims=True)               # (1, TB) int32
    greedy = jnp.minimum(greedy, jnp.int32(a - 1))              # all-NaN row guard

    explore = u_ref[...] < jnp.float32(epsilon)
    out_ref[...] = jnp.where(explore, rand_ref[...], greedy)


def epsilon_greedy_select(q_vals, u_explore, rand_actions, *, epsilon=0.05, tile_b=1024):
    """Epsilon-greedy selection.

    q_vals:       (B, A) float32 Q-values
    u_explore:    (B,)   float32 uniform draws in [0, 1)  (the np.random.rand())
    rand_actions: (B,)   int32   uniform random actions   (the np.random.choice())
    Returns (B,) int32 selected actions.
    """
    B, A = q_vals.shape

    # Lane-dense tiling of the batch axis: TB multiple of 128, capped so a
    # double-buffered (A, TB) f32 block stays well inside even v5e's 16 MiB
    # scoped-VMEM default.
    tb_cap = max(128, ((4 * 1024 * 1024) // (A * 4)) // 128 * 128)
    TB = min(tile_b, tb_cap, _round_up(B, 128))
    B_pad = _round_up(B, TB)
    num_tiles = B_pad // TB

    # Wrapper-side layout plumbing: batch -> lanes, pad to a tile multiple.
    q_t = jnp.pad(q_vals.T.astype(jnp.float32), ((0, 0), (0, B_pad - B)))          # (A, B_pad)
    u = jnp.pad(u_explore.astype(jnp.float32), (0, B_pad - B),
                constant_values=1.0).reshape(1, B_pad)                              # pad -> never explore
    r = jnp.pad(rand_actions.astype(jnp.int32), (0, B_pad - B)).reshape(1, B_pad)

    kernel = functools.partial(_eps_greedy_kernel, epsilon=float(epsilon))

    out = pl.pallas_call(
        kernel,
        out_shape=jax.ShapeDtypeStruct((1, B_pad), jnp.int32),
        grid=(num_tiles,),
        in_specs=[
            pl.BlockSpec((A, TB), lambda i: (0, i)),   # full action axis, batch tiled on lanes
            pl.BlockSpec((1, TB), lambda i: (0, i)),
            pl.BlockSpec((1, TB), lambda i: (0, i)),
        ],
        out_specs=pl.BlockSpec((1, TB), lambda i: (0, i)),
        compiler_params=pltpu.CompilerParams(
            dimension_semantics=("parallel",),
        ),
        cost_estimate=pl.CostEstimate(
            flops=2 * B_pad * A,
            transcendentals=0,
            bytes_accessed=B_pad * A * 4 + 3 * B_pad * 4,
        ),
    )(q_t, u, r)

    return out[0, :B]


if __name__ == "__main__":
    key = jax.random.PRNGKey(0)
    kq, ku, kr = jax.random.split(key, 3)

    B, A = 8, 16          # batch=8, n_actions=16
    epsilon = 0.05

    q_vals = jax.random.normal(kq, (B, A), dtype=jnp.float32)
    u_explore = jax.random.uniform(ku, (B,), dtype=jnp.float32)
    rand_actions = jax.random.randint(kr, (B,), 0, A, dtype=jnp.int32)

    actions = epsilon_greedy_select(q_vals, u_explore, rand_actions, epsilon=epsilon)
    actions = jax.block_until_ready(actions)

    # Pure-JAX reference with the same random draws.
    expected = jnp.where(u_explore < epsilon,
                         rand_actions,
                         jnp.argmax(q_vals, axis=1).astype(jnp.int32))

    assert actions.shape == (B,)
    assert actions.dtype == jnp.int32
    assert bool(jnp.all((actions >= 0) & (actions < A)))
    assert bool(jnp.array_equal(actions, expected))

    print("KERNEL_OK")
</pallas_src>

<mosaic_0001>
module attributes {stable_mosaic.version = 11 : i64} {
  func.func @_eps_greedy_kernel(%arg0: i32, %arg1: memref<16x128xf32, #tpu.memory_space<vmem>>, %arg2: memref<1x128xf32, #tpu.memory_space<vmem>>, %arg3: memref<1x128xi32, #tpu.memory_space<vmem>>, %arg4: memref<1x128xi32, #tpu.memory_space<vmem>>) attributes {dimension_semantics = [#tpu.dimension_semantics<parallel>], iteration_bounds = array<i64: 1>, scalar_prefetch = 0 : i64, scratch_operands = 0 : i64, tpu.core_type = #tpu.core_type<tc>, window_params = [{transform_indices = @transform_0, window_bounds = array<i64: 16, 128>}, {transform_indices = @transform_1, window_bounds = array<i64: 1, 128>}, {transform_indices = @transform_2, window_bounds = array<i64: 1, 128>}, {transform_indices = @transform_3, window_bounds = array<i64: 1, 128>}]} {
    %c0 = arith.constant 0 : index
    %c0_0 = arith.constant 0 : index
    %0 = vector.load %arg1[%c0, %c0_0] : memref<16x128xf32, #tpu.memory_space<vmem>>, vector<16x128xf32>
    %1 = tpu.iota {dimensions = array<i32: 0>} : vector<16x128xi32>
    %cst = arith.constant dense<0xFF800000> : vector<128xf32>
    %2 = vector.multi_reduction <maximumf>, %0, %cst [0] : vector<16x128xf32> to vector<128xf32>
    %3 = vector.shape_cast %2 : vector<128xf32> to vector<1x128xf32>
    %4 = vector.broadcast %3 : vector<1x128xf32> to vector<16x128xf32>
    %5 = arith.cmpf oeq, %0, %4 : vector<16x128xf32>
    %c16_i32 = arith.constant 16 : i32
    %6 = vector.broadcast %c16_i32 : i32 to vector<16x128xi32>
    %7 = arith.select %5, %1, %6 : vector<16x128xi1>, vector<16x128xi32>
    %cst_1 = arith.constant dense<2147483647> : vector<128xi32>
    %8 = vector.multi_reduction <minsi>, %7, %cst_1 [0] : vector<16x128xi32> to vector<128xi32>
    %9 = vector.shape_cast %8 : vector<128xi32> to vector<1x128xi32>
    %c15_i32 = arith.constant 15 : i32
    %10 = vector.broadcast %c15_i32 : i32 to vector<1x128xi32>
    %11 = arith.minsi %9, %10 : vector<1x128xi32>
    %c0_2 = arith.constant 0 : index
    %c0_3 = arith.constant 0 : index
    %12 = vector.load %arg2[%c0_2, %c0_3] : memref<1x128xf32, #tpu.memory_space<vmem>>, vector<1x128xf32>
    %cst_4 = arith.constant 5.000000e-02 : f32
    %13 = vector.broadcast %cst_4 : f32 to vector<1x128xf32>
    %14 = arith.cmpf olt, %12, %13 : vector<1x128xf32>
    %c0_5 = arith.constant 0 : index
    %c0_6 = arith.constant 0 : index
    %15 = vector.load %arg3[%c0_5, %c0_6] : memref<1x128xi32, #tpu.memory_space<vmem>>, vector<1x128xi32>
    %16 = arith.select %14, %15, %11 : vector<1x128xi1>, vector<1x128xi32>
    %c0_7 = arith.constant 0 : index
    %c0_8 = arith.constant 0 : index
    %17 = vector.load %arg4[%c0_7, %c0_8] : memref<1x128xi32, #tpu.memory_space<vmem>>, vector<1x128xi32>
    tpu.vector_store %arg4[%c0_7, %c0_8], %16 {strides = array<i32>} : memref<1x128xi32, #tpu.memory_space<vmem>>, vector<1x128xi32>,
    return
  }
  func.func @transform_0(%arg0: i32) -> (i32, i32) {
    %c0_i32 = arith.constant 0 : i32
    %c0_i32_0 = arith.constant 0 : i32
    return %c0_i32, %arg0 : i32, i32
  }
  func.func @transform_1(%arg0: i32) -> (i32, i32) {
    %c0_i32 = arith.constant 0 : i32
    %c0_i32_0 = arith.constant 0 : i32
    return %c0_i32, %arg0 : i32, i32
  }
  func.func @transform_2(%arg0: i32) -> (i32, i32) {
    %c0_i32 = arith.constant 0 : i32
    %c0_i32_0 = arith.constant 0 : i32
    return %c0_i32, %arg0 : i32, i32
  }
  func.func @transform_3(%arg0: i32) -> (i32, i32) {
    %c0_i32 = arith.constant 0 : i32
    %c0_i32_0 = arith.constant 0 : i32
    return %c0_i32, %arg0 : i32, i32
  }
}

</mosaic_0001>

<bundles_post_ra>
// kernel: tpu_custom_call.1
= control target key start
LH: loop header
LB: loop body
LE: loop exit
PB: predicated region body
PF: predicated region fallthrough
CT: control target
= control target key end

     0   :  { %8 = vsyncpa [#allocation3], 0  ;;  %s217_s0 = inlined_call_operand.hbm [shape: f32[16,128], index: 0, kind: input, shape index: {}]   ;;  %s218_s1 = inlined_call_operand.hbm [shape: f32[1,128], index: 1, kind: input, shape index: {}]   ;;  %s219_s2 = inlined_call_operand.vmem [shape: s32[1,128], index: 2, kind: input, shape index: {}]   ;;  %s220_s3 = inlined_call_operand.hbm [shape: s32[1,128], index: 3, kind: output, shape index: {}]  }
   0x1   :  { %9 = vsyncpa [#allocation6], 0 }
   0x2   :  { %10 = vsyncpa [#allocation4], 0  ;;  %s15_s14 = sshll.u32 %s217_s0, 4  ;;  %s180_s15 = smov [#allocation2]   ;;  %s16_s14 = int_to_ptr.hbm [resolvable:$true] %s15_s14 }
   0x3   :  { %s17_s16 = sshll.u32 %s180_s15, 4  ;;  %s29_s19 = sshll.u32 %s218_s1, 4  ;;  %s18_s16 = int_to_ptr.vmem [resolvable:$true] %s17_s16  ;;  %s30_s19 = int_to_ptr.hbm [resolvable:$true] %s29_s19 }
   0x4   :  { %s181_s20 = smov 128   ;;  %s182_s21 = smov 8  }
   0x5   :  { %23 = dma.hbm_to_vmem [thread:$0]  %s16_s14, 256, %s18_s16, [#allocation3], %s181_s20, %s181_s20, %s182_s21  }
   0x6   :  { %s183_s22 = smov [#allocation5]  }
   0x7   :  { %s31_s23 = sshll.u32 %s183_s22, 4  ;;  %s32_s23 = int_to_ptr.vmem [resolvable:$true] %s31_s23 }
   0x8   :  { %34 = dma.hbm_to_vmem [thread:$0]  %s30_s19, 16, %s32_s23, [#allocation6]  }
   0x9   :  { %174 = dma.done.wait [#allocation3], 256  }
   0xa   :  { %175 = vsyncadd [#allocation3], 4294967040 }
   0xb   :  { %176 = dma.done.wait [#allocation6], 16  }
   0xc   :  { %177 = vsyncadd [#allocation6], 4294967280  ;;  %v45_v0 = vld [vmem:[#allocation2] sm:$0xff]  ;;  %v46_v1 = vld [vmem:[#allocation2 + $0x8] sm:$0xff]  ;;  %v47_v4 = vlaneseq  ;;  %s184_s0 = smov [#allocation7]   ;;  %s86_s26 = sshll.u32 %s220_s3, 4  ;;  %s87_s26 = int_to_ptr.hbm [resolvable:$true] %s86_s26 }
   0xd   :  { %v50_v2 = vmax.f32 %v45_v0, %v46_v1  ;;  %v74_v20 = vld [vmem:[#allocation5] sm:$0x1]  ;;  %s84_s1 = sshll.u32 %s184_s0, 4  ;;  %v76_v22 = vld [vmem:[%s219_s2] sm:$0x1]  ;;  %s85_s1 = int_to_ptr.vmem [resolvable:$true] %s84_s1 }
   0xe   :  { %v48_v7 = vshrl.u32 %v47_v4, 7  ;;  %vm75_vm6 = vcmp.lt.f32.partialorder %v74_v20, 0.05 }
   0xf   :  { %v51_v3 = vrot.slane %v50_v2, 4 }
  0x10   :  { %v49_v10 = vadd.s32 8, %v48_v7 }
  0x11   :  { %v52_v5 = vmax.f32 %v50_v2, %v51_v3 }
  0x13   :  { %v53_v6 = vrot.slane %v52_v5, 2 }
  0x15   :  { %v54_v8 = vmax.f32 %v52_v5, %v53_v6 }
  0x17   :  { %v55_v9 = vrot.slane %v54_v8, 1 }
  0x19   :  { %v56_v11 = vmax.f32 %v54_v8, %v55_v9 }
  0x1b   :  { %vm57_vm0 = vcmp.eq.f32.partialorder %v45_v0, %v56_v11  ;;  %vm58_vm1 = vcmp.eq.f32.partialorder %v46_v1, %v56_v11 }
  0x1c   :  { %v59_v12 = vsel %vm57_vm0, %v48_v7, 16  ;;  %v60_v13 = vsel %vm58_vm1, %v49_v10, 16 }
  0x1d   :  { %vm61_vm2 = vcmp.lt.s32.totalorder %v59_v12, %v60_v13 }
  0x1e   :  { %v62_v14 = vsel %vm61_vm2, %v59_v12, %v60_v13 }
  0x1f   :  { %v63_v15 = vrot.slane %v62_v14, 4 }
  0x21   :  { %vm64_vm3 = vcmp.lt.s32.totalorder %v62_v14, %v63_v15 }
  0x22   :  { %v65_v16 = vsel %vm64_vm3, %v62_v14, %v63_v15 }
  0x23   :  { %v66_v17 = vrot.slane %v65_v16, 2 }
  0x25   :  { %vm67_vm4 = vcmp.lt.s32.totalorder %v65_v16, %v66_v17 }
  0x26   :  { %v68_v18 = vsel %vm67_vm4, %v65_v16, %v66_v17 }
  0x27   :  { %v69_v19 = vrot.slane %v68_v18, 1 }
  0x29   :  { %vm70_vm5 = vcmp.lt.s32.totalorder %v68_v18, %v69_v19 }
  0x2a   :  { %v71_v21 = vsel %vm70_vm5, %v68_v18, %v69_v19 }
  0x2b   :  { %vm72_vm7 = vcmp.lt.s32.totalorder %v71_v21, 15 }
  0x2c   :  { %v73_v23 = vsel %vm72_vm7, %v71_v21, 15 }
  0x2d   :  { %v77_v24 = vsel %vm75_vm6, %v76_v22, %v73_v23 }
  0x2e   :  { %78 = vst [vmem:[#allocation7] sm:$0x1] %v77_v24 }
  0x2f   :  { %89 = dma.vmem_to_hbm [thread:$0]  %s85_s1, 16, %s87_s26, [#allocation4]  }
  0x30   :  { %178 = dma.done.wait [#allocation4], 16  }
  0x31   :  { %179 = vsyncadd [#allocation4], 4294967280 }
  0x32   :  { %94 = vsyncpa [#allocation3], 1 }
  0x33   :  { %95 = vsyncpa [#allocation6], 1 }
  0x34   :  { %96 = vsyncpa [#allocation4], 1 }

</bundles_post_ra>
